<compile_context>
chip_gen: v7x
topology: tpu7x:2x2x1
jax: 0.10.0
libtpu: 0.0.40
codegen_flags: <defaults>
</compile_context>

<pallas_src>
import jax
import jax.numpy as jnp
from jax.experimental import pallas as pl
from jax.experimental.pallas import tpu as pltpu

_LANES = 128
_TARGET_BLOCK_BYTES = 2 << 20    # ~2 MiB/buffer -> 3 arrays x 2 bufs = 12 MiB VMEM
_MIN_GRID_STEPS = 4              # keep >= 4 parallel steps so v7x can split across TCs
_SMALL_BYTES = 32 << 20          # below this, fused XLA abs(a-b) is the better path


def _abs_diff_kernel(out_ref, gt_ref, loss_ref):
    # Elementwise |out - gt| on one lane-dense (tile_rows, 128) block in VMEM.
    loss_ref[...] = jnp.abs(out_ref[...] - gt_ref[...])


def rel_root_depth_loss(root_depth_out, root_depth_gt, *, force_pallas=False):
    assert root_depth_out.shape == root_depth_gt.shape
    assert root_depth_out.dtype == root_depth_gt.dtype

    orig_shape = root_depth_out.shape
    dtype = root_depth_out.dtype
    n = root_depth_out.size
    itemsize = jnp.dtype(dtype).itemsize

    # Primary path: plain XLA fusion. An elementwise L1 is memory-bound and XLA
    # already hits roofline (and fuses into the downstream reduction this loss
    # almost always feeds). Only very large standalone calls take the Pallas path.
    if not force_pallas and (n == 0 or n * itemsize < _SMALL_BYTES):
        return jnp.abs(root_depth_out - root_depth_gt)

    # ---------------- lane-dense tiled Pallas path ----------------
    # Pad at most to the next multiple of 128 (skipped when already aligned);
    # partial final sublane blocks are handled by the cdiv grid, so no padding
    # to a full (tile_rows * 128) block is ever needed.
    rem = n % _LANES
    n_pad = n if rem == 0 else n + (_LANES - rem)
    rows = n_pad // _LANES

    def to_lane_dense(x):
        x = x.reshape(-1)
        if n_pad != n:
            x = jnp.pad(x, (0, n_pad - n))
        return x.reshape(rows, _LANES)

    a = to_lane_dense(root_depth_out)
    b = to_lane_dense(root_depth_gt)

    # Block sizing: ~2 MiB per buffer, capped so the grid keeps at least
    # _MIN_GRID_STEPS steps (v7x megacore split); sublane dim is a multiple of 8
    # or the full extent for tiny inputs.
    target_rows = max(8, _TARGET_BLOCK_BYTES // (_LANES * itemsize))
    tile_rows = min(target_rows, pl.cdiv(rows, _MIN_GRID_STEPS))
    tile_rows = min(((tile_rows + 7) // 8) * 8, rows)
    grid = (pl.cdiv(rows, tile_rows),)

    spec = pl.BlockSpec((tile_rows, _LANES), lambda i: (i, 0))
    out = pl.pallas_call(
        _abs_diff_kernel,
        out_shape=jax.ShapeDtypeStruct((rows, _LANES), dtype),
        grid=grid,
        in_specs=[spec, spec],
        out_specs=spec,
        compiler_params=pltpu.CompilerParams(
            dimension_semantics=("parallel",),
            allow_input_fusion=[True, True],
        ),
        cost_estimate=pl.CostEstimate(
            flops=n, transcendentals=0, bytes_accessed=3 * n * itemsize),
    )(a, b)

    flat = out.reshape(-1)
    if n_pad != n:
        flat = flat[:n]
    return flat.reshape(orig_shape)


if __name__ == "__main__":
    key = jax.random.PRNGKey(0)
    k1, k2, k3, k4, k5, k6 = jax.random.split(key, 6)

    # 1) Production-like tiny shape: (batch, 1) relative root depth (fallback path).
    batch = 2
    small_out = jax.random.normal(k1, (batch, 1), dtype=jnp.float32)
    small_gt = jax.random.normal(k2, (batch, 1), dtype=jnp.float32)
    small_loss = jax.block_until_ready(rel_root_depth_loss(small_out, small_gt))
    small_ref = jnp.abs(small_out - small_gt)
    assert small_loss.shape == small_ref.shape and small_loss.dtype == small_ref.dtype
    assert jnp.allclose(small_loss, small_ref, atol=1e-6, rtol=1e-6)

    # 2) Lane-aligned input that exercises the tiled Pallas path (forced so the
    #    test stays small): rows=1024 -> tile_rows=256 -> 4 parallel grid steps.
    mid_out = jax.random.normal(k3, (256, 512), dtype=jnp.float32)
    mid_gt = jax.random.normal(k4, (256, 512), dtype=jnp.float32)
    mid_loss = jax.block_until_ready(
        rel_root_depth_loss(mid_out, mid_gt, force_pallas=True))
    mid_ref = jnp.abs(mid_out - mid_gt)
    assert mid_loss.shape == mid_ref.shape and mid_loss.dtype == mid_ref.dtype
    assert jnp.allclose(mid_loss, mid_ref, atol=1e-6, rtol=1e-6)

    # 3) Non-128-aligned input: exercises the minimal (<128 elem) pad + partial block.
    odd_out = jax.random.normal(k5, (37, 19), dtype=jnp.float32)
    odd_gt = jax.random.normal(k6, (37, 19), dtype=jnp.float32)
    odd_loss = jax.block_until_ready(
        rel_root_depth_loss(odd_out, odd_gt, force_pallas=True))
    odd_ref = jnp.abs(odd_out - odd_gt)
    assert odd_loss.shape == odd_ref.shape and odd_loss.dtype == odd_ref.dtype
    assert jnp.allclose(odd_loss, odd_ref, atol=1e-6, rtol=1e-6)

    print("KERNEL_OK")
</pallas_src>

<mosaic_0001>
module attributes {stable_mosaic.version = 11 : i64} {
  func.func @_abs_diff_kernel(%arg0: i32, %arg1: memref<256x128xf32, #tpu.memory_space<vmem>>, %arg2: memref<256x128xf32, #tpu.memory_space<vmem>>, %arg3: memref<256x128xf32, #tpu.memory_space<vmem>>) attributes {dimension_semantics = [#tpu.dimension_semantics<parallel>], iteration_bounds = array<i64: 4>, scalar_prefetch = 0 : i64, scratch_operands = 0 : i64, tpu.core_type = #tpu.core_type<tc>, window_params = [{transform_indices = @transform_0, window_bounds = array<i64: 256, 128>}, {transform_indices = @transform_1, window_bounds = array<i64: 256, 128>}, {transform_indices = @transform_2, window_bounds = array<i64: 256, 128>}]} {
    %c0 = arith.constant 0 : index
    %c0_0 = arith.constant 0 : index
    %0 = vector.load %arg1[%c0, %c0_0] : memref<256x128xf32, #tpu.memory_space<vmem>>, vector<256x128xf32>
    %c0_1 = arith.constant 0 : index
    %c0_2 = arith.constant 0 : index
    %1 = vector.load %arg2[%c0_1, %c0_2] : memref<256x128xf32, #tpu.memory_space<vmem>>, vector<256x128xf32>
    %2 = arith.subf %0, %1 : vector<256x128xf32>
    %3 = math.absf %2 : vector<256x128xf32>
    %c0_3 = arith.constant 0 : index
    %c0_4 = arith.constant 0 : index
    %4 = vector.load %arg3[%c0_3, %c0_4] : memref<256x128xf32, #tpu.memory_space<vmem>>, vector<256x128xf32>
    tpu.vector_store %arg3[%c0_3, %c0_4], %3 {strides = array<i32>} : memref<256x128xf32, #tpu.memory_space<vmem>>, vector<256x128xf32>,
    return
  }
  func.func @transform_0(%arg0: i32) -> (i32, i32) {
    %c0_i32 = arith.constant 0 : i32
    %c0_i32_0 = arith.constant 0 : i32
    return %arg0, %c0_i32 : i32, i32
  }
  func.func @transform_1(%arg0: i32) -> (i32, i32) {
    %c0_i32 = arith.constant 0 : i32
    %c0_i32_0 = arith.constant 0 : i32
    return %arg0, %c0_i32 : i32, i32
  }
  func.func @transform_2(%arg0: i32) -> (i32, i32) {
    %c0_i32 = arith.constant 0 : i32
    %c0_i32_0 = arith.constant 0 : i32
    return %arg0, %c0_i32 : i32, i32
  }
}

</mosaic_0001>

<bundles_post_ra>
// kernel: tpu_custom_call.1
= control target key start
LH: loop header
LB: loop body
LE: loop exit
PB: predicated region body
PF: predicated region fallthrough
CT: control target
= control target key end

     0   :  { %7 = vsyncpa [#allocation3], 0  ;;  %s1034_s0 = inlined_call_operand.hbm [shape: f32[1024,128], index: 0, kind: input, shape index: {}]   ;;  %s1035_s1 = inlined_call_operand.hbm [shape: f32[1024,128], index: 1, kind: input, shape index: {}]   ;;  %s1036_s2 = inlined_call_operand.hbm [shape: f32[1024,128], index: 2, kind: output, shape index: {}]  }
   0x1   :  { %9 = vsyncpa [#allocation3 + $0x1], 0 }
   0x2   :  { %10 = vsyncpa [#allocation6], 0 }
   0x3   :  { %12 = vsyncpa [#allocation6 + $0x1], 0 }
   0x4   :  { %13 = vsyncpa [#allocation4], 0 }
   0x5   :  { %15 = vsyncpa [#allocation4 + $0x1], 0  ;;  %s705_s9 = smov 0   ;;  %s707_s10 = smov 0  }
   0x6   :  { %s709_s11 = smov 0   ;;  %s711_s12 = smov 0  }
   0x7 LB: > { %s726_s13 = sadd.s32 4294967295, %s681_s12   ;;  %s475_s14 = sadd.s32 4294967294, %s681_s12   ;;  %s681_s12 = sphi %s711_s12, %s1051_s12   ;;  %s677_s11 = sphi %s709_s11, %s1050_s11   ;;  %s673_s10 = sphi %s707_s10, %s1049_s10   ;;  %s669_s9 = sphi %s705_s9, %s1048_s9  }
   0x8   : > { %s730_s15 = sadd.s32 1, %s681_s12   ;;  %s28_s16 = sadd.s32 1, %s677_s11 }
   0x9   : > { %s25_s17 = ssub.s32 %s681_s12, %s730_s15  ;;  %p35_p0 = scmp.ne.s32.totalorder %s677_s11, %s673_s10 }
   0xa   : > { %p26_p1 = scmp.eq.s32.totalorder %s25_s17, 0  ;;  %p36_p2 = scmp.eq.s32.totalorder %s681_s12, 0 }
   0xb   : > { %p41_p3 = scmp.ne.s32.totalorder %s673_s10, %s669_s9  ;;  %p42_p4 = scmp.eq.s32.totalorder %s726_s13, 0 }
   0xc   : > { %s742_s18 = scalar_select %p26_p1, %s677_s11, %s28_s16  }
   0xd   : > { %p744_p5 = por %p36_p2, %p35_p0  ;;  %p748_p6 = por %p42_p4, %p41_p3 }
   0xe   : > { %p91_p7 = scmp.eq.s32.totalorder %s726_s13, 3  ;;  %p97_p8 = scmp.eq.s32.totalorder %s475_s14, 3 }
   0xf   : > { %s1040_s20 = scalar_select %p748_p6, 1, 0 }
  0x10   : > { %p513_p9 = scmp.lt.s32.totalorder %s681_s12, 4  ;;  %p754_p10 = por %p91_p7, %p35_p0 }
  0x11   : > { %p758_p11 = por %p97_p8, %p41_p3  ;;  %s763_s23 = sand.u32 1, %s677_s11  }
  0x12   : > { %s1041_s21 = scalar_select %p754_p10, 1, 0 }
  0x13   : > { %s1042_s22 = scalar_select %p758_p11, 1, 0 }
  0x14   : > { %s493_s24 = sshll.u32 %s681_s12, 12  ;;  %s478_s25 = sshll.u32 %s763_s23, 8 }
  0x15   : > { %s772_s28 = scalar_lea.hbm %s1034_s0, %s493_s24  ;;  %s121_s29 = scalar_lea.vmem [#allocation2], %s478_s25 }
  0x16   : > { %s128_s30 = sshll.u32 %s121_s29, 4  ;;  %p778_p12 = pnand %p513_p9, %p744_p5  ;;  %s782_s30 = int_to_ptr.vmem [resolvable:$true] %s128_s30 }
  0x17   : > { %s118_s4 = scalar_lea.sflag [#allocation3], %s763_s23  ;;  %s551_s5 = scalar_lea.hbm %s772_s28, 4096 }
  0x18   : > { %p552_p13 = scmp.ne.s32.totalorder %s772_s28, %s551_s5  ;;  %p553_p0 = pneg %p778_p12 }
  0x19   : > { %s556_s8 = scalar_lea.hbm %s1034_s0, 16384  ;;  %p557_p3 = scmp.lt.u32.totalorder %s772_s28, %s1034_s0 }
  0x1a   : > { %p554_p1 = pnand %p553_p0, %p552_p13  ;;  %p558_p4 = scmp.lt.u32.totalorder %s556_s8, %s551_s5 }
  0x1b   : > { %p560_p7 = scmp.lt.u32.totalorder %s551_s5, %s772_s28 }
  0x1c   : > { %p555_p2 = pneg %p554_p1  ;;  %p559_p5 = por %p558_p4, %p557_p3 }
  0x1e   : > { %p561_p8 = por %p560_p7, %p559_p5 }
  0x20   : > { %p562_p9 = pnand %p561_p8, %p555_p2 }
  0x22   : > { %565 = shalt.err (!%p562_p9)
}
  0x23   : > { %s566_s17 = scalar_lea.vmem %s782_s30, 4096  ;;  %s683_s19 = smov [#allocation2]  }
  0x24   : > { %p567_p13 = scmp.ne.s32.totalorder %s782_s30, %s566_s17  ;;  %s571_s26 = sshll.u32 %s683_s19, 4  ;;  %s572_s26 = int_to_ptr.vmem [resolvable:$false] %s571_s26 }
  0x25   : > { %s573_s27 = scalar_lea.vmem %s572_s26, 8192  ;;  %p574_p10 = scmp.lt.s32.totalorder %s782_s30, %s572_s26 }
  0x26   : > { %p569_p1 = pnand %p567_p13, %p553_p0  ;;  %p575_p3 = scmp.lt.s32.totalorder %s573_s27, %s566_s17 }
  0x28   : > { %p570_p11 = pneg %p569_p1  ;;  %p576_p4 = por %p575_p3, %p574_p10 }
  0x2a   : > { %p577_p5 = pnand %p576_p4, %p570_p11 }
  0x2c   : > { %580 = shalt.err (!%p577_p5)
}
  0x2d   : > { %s684_s29 = smov 128   ;;  %s685_s5 = smov 8  }
  0x2e   : > { %505 = dma.hbm_to_vmem [thread:$0]  (!%p778_p12), %s772_s28, 4096, %s782_s30, %s118_s4, %s684_s29, %s684_s29, %s685_s5  }
  0x2f   : > { %p484_p10 = scmp.ge.s32.totalorder %s681_s12, 1  ;;  %p157_p11 = scmp.lt.s32.totalorder %s681_s12, 5 }
  0x30   : > { %s826_s14 = scalar_lea.hbm %s1035_s1, %s493_s24  ;;  %s142_s16 = scalar_lea.vmem [#allocation5], %s478_s25 }
  0x31   : > { %p817_p2 = pnand %p484_p10, %p157_p11  ;;  %s149_s17 = sshll.u32 %s142_s16, 4  ;;  %s830_s17 = int_to_ptr.vmem [resolvable:$true] %s149_s17 }
  0x32   : > { %s139_s28 = scalar_lea.sflag [#allocation6], %s763_s23  ;;  %s581_s30 = scalar_lea.hbm %s826_s14, 4096 }
  0x33   : > { %p582_p7 = scmp.ne.s32.totalorder %s826_s14, %s581_s30  ;;  %s586_s24 = scalar_lea.hbm %s1035_s1, 16384 }
  0x34   : > { %p587_p13 = scmp.lt.u32.totalorder %s826_s14, %s1035_s1  ;;  %p588_p1 = scmp.lt.u32.totalorder %s586_s24, %s581_s30 }
  0x35   : > { %p584_p8 = pnand %p582_p7, %p553_p0  ;;  %p590_p4 = scmp.lt.u32.totalorder %s581_s30, %s826_s14 }
  0x36   : > { %p589_p3 = por %p588_p1, %p587_p13 }
  0x37   : > { %p585_p9 = pneg %p584_p8 }
  0x38   : > { %p591_p5 = por %p590_p4, %p589_p3 }
  0x3a   : > { %p592_p10 = pnand %p591_p5, %p585_p9 }
  0x3c   : > { %595 = shalt.err (!%p592_p10)
}
  0x3d   : > { %s596_s25 = scalar_lea.vmem %s830_s17, 4096  ;;  %s686_s7 = smov [#allocation5]  }
  0x3e   : > { %p597_p11 = scmp.ne.s32.totalorder %s830_s17, %s596_s25  ;;  %s601_s8 = sshll.u32 %s686_s7, 4  ;;  %s602_s8 = int_to_ptr.vmem [resolvable:$false] %s601_s8 }
  0x3f   : > { %s603_s16 = scalar_lea.vmem %s602_s8, 8192  ;;  %p604_p6 = scmp.lt.s32.totalorder %s830_s17, %s602_s8 }
  0x40   : > { %p599_p7 = pnand %p597_p11, %p553_p0  ;;  %p605_p13 = scmp.lt.s32.totalorder %s603_s16, %s596_s25 }
  0x42   : > { %p600_p8 = pneg %p599_p7  ;;  %p606_p1 = por %p605_p13, %p604_p6 }
  0x44   : > { %p607_p3 = pnand %p606_p1, %p600_p8 }
  0x46   : > { %610 = shalt.err (!%p607_p3)
}
  0x47   : > { %508 = dma.hbm_to_vmem [thread:$0]  (!%p778_p12), %s826_s14, 4096, %s830_s17, %s139_s28, %s684_s29, %s684_s29, %s685_s5  }
  0x48   : > { %161 = sbr.rel (%p817_p2) target bundleno = 129 (0x81), region = 28  ;;  %s864_s30 = sand.u32 (!%p817_p2), 1, %s673_s10  }
  0x49   : > { %s867_s4 = sshll.u32 (!%p817_p2), %s864_s30, 8  ;;  %s164_s3 = scalar_lea.sflag (!%p817_p2), [#allocation3], %s864_s30 }
  0x4a   : > { %s871_s19 = scalar_lea.vmem (!%p817_p2), [#allocation2], %s867_s4  ;;  %p1045_p6 = scmp.ne.s32.totalorder (!%p817_p2), %s1040_s20, 0 }
  0x4f   : > { %656 = dma.done.wait (%p1045_p6), %s164_s3, 4096  }
  0x50   : > { %658 = vsyncadd (%p1045_p6), %s164_s3, 4294963200  ;;  %s173_s23 = scalar_lea.sflag [#allocation6], %s864_s30  ;;  %s879_s29 = scalar_lea.vmem [#allocation5], %s867_s4 }
  0x51   : > { %660 = dma.done.wait (%p1045_p6), %s173_s23, 4096  }
  0x52   : > { %662 = vsyncadd (%p1045_p6), %s173_s23, 4294963200  ;;  %v205_v0 = vld [vmem:[%s871_s19] sm:$0xff]  ;;  %v206_v2 = vld [vmem:[%s871_s19 + $0x8] sm:$0xff]  ;;  %s900_s20 = scalar_lea.vmem [#allocation7], %s867_s4  ;;  %s495_s5 = sshll.u32 %s726_s13, 12 }
  0x53   : > { %v237_v1 = vld [vmem:[%s879_s29] sm:$0xff]  ;;  %v238_v4 = vld [vmem:[%s879_s29 + $0x8] sm:$0xff]  ;;  %v207_v5 = vld [vmem:[%s871_s19 + $0x10] sm:$0xff]  ;;  %s379_s6 = sshll.u32 %s900_s20, 4  ;;  %s985_s17 = scalar_lea.hbm %s1036_s2, %s495_s5  ;;  %s987_s6 = int_to_ptr.vmem [resolvable:$true] %s379_s6 }
  0x54   : > { %v269_v3 = vsub.f32 %v205_v0, %v237_v1  ;;  %v239_v6 = vld [vmem:[%s879_s29 + $0x10] sm:$0xff]  ;;  %v270_v7 = vsub.f32 %v206_v2, %v238_v4  ;;  %v208_v9 = vld [vmem:[%s871_s19 + $0x18] sm:$0xff]  ;;  %v209_v11 = vld [vmem:[%s871_s19 + $0x20] sm:$0xff]  ;;  %s366_s28 = scalar_lea.sflag [#allocation4], %s864_s30  ;;  %s611_s24 = scalar_lea.vmem %s987_s6, 4096 }
  0x55   : > { %v271_v8 = vsub.f32 %v207_v5, %v239_v6  ;;  %v240_v10 = vld [vmem:[%s879_s29 + $0x18] sm:$0xff]  ;;  %v241_v14 = vld [vmem:[%s879_s29 + $0x20] sm:$0xff]  ;;  %v210_v15 = vld [vmem:[%s871_s19 + $0x28] sm:$0xff]  ;;  %p612_p12 = scmp.ne.s32.totalorder %s987_s6, %s611_s24  ;;  %p1046_p0 = scmp.ne.s32.totalorder %s1041_s21, 0 }
  0x56   : > { %v301_v12 = vand.u32 2147483647, %v269_v3  ;;  %v272_v13 = vsub.f32 %v208_v9, %v240_v10  ;;  %v242_v16 = vld [vmem:[%s879_s29 + $0x28] sm:$0xff]  ;;  %v302_v17 = vand.u32 2147483647, %v270_v7  ;;  %v273_v19 = vsub.f32 %v209_v11, %v241_v14  ;;  %v211_v21 = vld [vmem:[%s871_s19 + $0x30] sm:$0xff] }
  0x57   : > { %v303_v18 = vand.u32 2147483647, %v271_v8  ;;  %v274_v20 = vsub.f32 %v210_v15, %v242_v16  ;;  %v243_v22 = vld [vmem:[%s879_s29 + $0x30] sm:$0xff]  ;;  %v212_v25 = vld [vmem:[%s871_s19 + $0x38] sm:$0xff]  ;;  %v213_v27 = vld [vmem:[%s871_s19 + $0x40] sm:$0xff]  ;;  %p613_p2 = pnand %p612_p12, %p1046_p0  ;;  %s687_s26 = smov [#allocation7]  }
  0x58   : > { %333 = vst [vmem:[%s900_s20] sm:$0xff] %v301_v12  ;;  %v304_v23 = vand.u32 2147483647, %v272_v13  ;;  %v275_v24 = vsub.f32 %v211_v21, %v243_v22  ;;  %v244_v26 = vld [vmem:[%s879_s29 + $0x38] sm:$0xff]  ;;  %334 = vst [vmem:[%s900_s20 + $0x8] sm:$0xff] %v302_v17  ;;  %v305_v28 = vand.u32 2147483647, %v273_v19 }
  0x59   : > { %335 = vst [vmem:[%s900_s20 + $0x10] sm:$0xff] %v303_v18  ;;  %v306_v29 = vand.u32 2147483647, %v274_v20  ;;  %v276_v30 = vsub.f32 %v212_v25, %v244_v26  ;;  %v245_v31 = vld [vmem:[%s879_s29 + $0x40] sm:$0xff]  ;;  %v214_v32 = vld [vmem:[%s871_s19 + $0x48] sm:$0xff]  ;;  %v215_v36 = vld [vmem:[%s871_s19 + $0x50] sm:$0xff]  ;;  %p614_p9 = pneg %p613_p2 }
  0x5a   : > { %336 = vst [vmem:[%s900_s20 + $0x18] sm:$0xff] %v304_v23  ;;  %v307_v33 = vand.u32 2147483647, %v275_v24  ;;  %v277_v34 = vsub.f32 %v213_v27, %v245_v31  ;;  %v246_v35 = vld [vmem:[%s879_s29 + $0x48] sm:$0xff]  ;;  %v247_v37 = vld [vmem:[%s879_s29 + $0x50] sm:$0xff]  ;;  %337 = vst [vmem:[%s900_s20 + $0x20] sm:$0xff] %v305_v28 }
  0x5b   : > { %338 = vst [vmem:[%s900_s20 + $0x28] sm:$0xff] %v306_v29  ;;  %v308_v38 = vand.u32 2147483647, %v276_v30  ;;  %v278_v39 = vsub.f32 %v214_v32, %v246_v35  ;;  %v279_v40 = vsub.f32 %v215_v36, %v247_v37  ;;  %v216_v41 = vld [vmem:[%s871_s19 + $0x58] sm:$0xff]  ;;  %v217_v43 = vld [vmem:[%s871_s19 + $0x60] sm:$0xff]  ;;  %v218_v47 = vld [vmem:[%s871_s19 + $0x68] sm:$0xff] }
  0x5c   : > { %v248_v42 = vld [vmem:[%s879_s29 + $0x58] sm:$0xff]  ;;  %339 = vst [vmem:[%s900_s20 + $0x30] sm:$0xff] %v307_v33  ;;  %v309_v44 = vand.u32 2147483647, %v277_v34  ;;  %v249_v46 = vld [vmem:[%s879_s29 + $0x60] sm:$0xff]  ;;  %v250_v48 = vld [vmem:[%s879_s29 + $0x68] sm:$0xff] }
  0x5d   : > { %v280_v45 = vsub.f32 %v216_v41, %v248_v42  ;;  %340 = vst [vmem:[%s900_s20 + $0x38] sm:$0xff] %v308_v38  ;;  %v310_v49 = vand.u32 2147483647, %v278_v39  ;;  %v311_v50 = vand.u32 2147483647, %v279_v40  ;;  %v281_v51 = vsub.f32 %v217_v43, %v249_v46  ;;  %v219_v53 = vld [vmem:[%s871_s19 + $0x70] sm:$0xff] }
  0x5e   : > { %v282_v52 = vsub.f32 %v218_v47, %v250_v48  ;;  %v251_v54 = vld [vmem:[%s879_s29 + $0x70] sm:$0xff]  ;;  %341 = vst [vmem:[%s900_s20 + $0x40] sm:$0xff] %v309_v44  ;;  %v220_v57 = vld [vmem:[%s871_s19 + $0x78] sm:$0xff]  ;;  %v221_v59 = vld [vmem:[%s871_s19 + $0x80] sm:$0xff]  ;;  %s615_s27 = sshll.u32 %s687_s26, 4  ;;  %s616_s27 = int_to_ptr.vmem [resolvable:$false] %s615_s27 }
  0x5f   : > { %v312_v55 = vand.u32 2147483647, %v280_v45  ;;  %v283_v56 = vsub.f32 %v219_v53, %v251_v54  ;;  %v252_v58 = vld [vmem:[%s879_s29 + $0x78] sm:$0xff]  ;;  %342 = vst [vmem:[%s900_s20 + $0x48] sm:$0xff] %v310_v49  ;;  %343 = vst [vmem:[%s900_s20 + $0x50] sm:$0xff] %v311_v50  ;;  %v253_v63 = vld [vmem:[%s879_s29 + $0x80] sm:$0xff]  ;;  %p618_p4 = scmp.lt.s32.totalorder %s987_s6, %s616_s27 }
  0x60   : > { %v313_v60 = vand.u32 2147483647, %v281_v51  ;;  %v314_v61 = vand.u32 2147483647, %v282_v52  ;;  %v284_v62 = vsub.f32 %v220_v57, %v252_v58  ;;  %v222_v0 = vld [vmem:[%s871_s19 + $0x88] sm:$0xff]  ;;  %v285_v2 = vsub.f32 %v221_v59, %v253_v63  ;;  %v223_v4 = vld [vmem:[%s871_s19 + $0x90] sm:$0xff] }
  0x61   : > { %344 = vst [vmem:[%s900_s20 + $0x58] sm:$0xff] %v312_v55  ;;  %v315_v1 = vand.u32 2147483647, %v283_v56  ;;  %v254_v3 = vld [vmem:[%s879_s29 + $0x88] sm:$0xff]  ;;  %v255_v5 = vld [vmem:[%s879_s29 + $0x90] sm:$0xff]  ;;  %v224_v9 = vld [vmem:[%s871_s19 + $0x98] sm:$0xff] }
  0x62   : > { %345 = vst [vmem:[%s900_s20 + $0x60] sm:$0xff] %v313_v60  ;;  %346 = vst [vmem:[%s900_s20 + $0x68] sm:$0xff] %v314_v61  ;;  %v316_v6 = vand.u32 2147483647, %v284_v62  ;;  %v286_v7 = vsub.f32 %v222_v0, %v254_v3  ;;  %v287_v8 = vsub.f32 %v223_v4, %v255_v5  ;;  %v256_v10 = vld [vmem:[%s879_s29 + $0x98] sm:$0xff]  ;;  %v225_v11 = vld [vmem:[%s871_s19 + $0xa0] sm:$0xff] }
  0x63   : > { %347 = vst [vmem:[%s900_s20 + $0x70] sm:$0xff] %v315_v1  ;;  %v317_v12 = vand.u32 2147483647, %v285_v2  ;;  %v288_v13 = vsub.f32 %v224_v9, %v256_v10  ;;  %v257_v14 = vld [vmem:[%s879_s29 + $0xa0] sm:$0xff]  ;;  %v226_v15 = vld [vmem:[%s871_s19 + $0xa8] sm:$0xff]  ;;  %v227_v21 = vld [vmem:[%s871_s19 + $0xb0] sm:$0xff] }
  0x64   : > { %v258_v16 = vld [vmem:[%s879_s29 + $0xa8] sm:$0xff]  ;;  %348 = vst [vmem:[%s900_s20 + $0x78] sm:$0xff] %v316_v6  ;;  %v318_v17 = vand.u32 2147483647, %v286_v7  ;;  %v319_v18 = vand.u32 2147483647, %v287_v8  ;;  %v289_v19 = vsub.f32 %v225_v11, %v257_v14 }
  0x65   : > { %v290_v20 = vsub.f32 %v226_v15, %v258_v16  ;;  %v259_v22 = vld [vmem:[%s879_s29 + $0xb0] sm:$0xff]  ;;  %349 = vst [vmem:[%s900_s20 + $0x80] sm:$0xff] %v317_v12  ;;  %v320_v23 = vand.u32 2147483647, %v288_v13  ;;  %v228_v25 = vld [vmem:[%s871_s19 + $0xb8] sm:$0xff]  ;;  %v229_v27 = vld [vmem:[%s871_s19 + $0xc0] sm:$0xff] }
  0x66   : > { %v291_v24 = vsub.f32 %v227_v21, %v259_v22  ;;  %v260_v26 = vld [vmem:[%s879_s29 + $0xb8] sm:$0xff]  ;;  %350 = vst [vmem:[%s900_s20 + $0x88] sm:$0xff] %v318_v17  ;;  %351 = vst [vmem:[%s900_s20 + $0x90] sm:$0xff] %v319_v18  ;;  %v321_v28 = vand.u32 2147483647, %v289_v19  ;;  %v261_v31 = vld [vmem:[%s879_s29 + $0xc0] sm:$0xff] }
  0x67   : > { %v322_v29 = vand.u32 2147483647, %v290_v20  ;;  %v292_v30 = vsub.f32 %v228_v25, %v260_v26  ;;  %v230_v32 = vld [vmem:[%s871_s19 + $0xc8] sm:$0xff]  ;;  %352 = vst [vmem:[%s900_s20 + $0x98] sm:$0xff] %v320_v23  ;;  %v293_v34 = vsub.f32 %v229_v27, %v261_v31  ;;  %v231_v36 = vld [vmem:[%s871_s19 + $0xd0] sm:$0xff]  ;;  %v232_v41 = vld [vmem:[%s871_s19 + $0xd8] sm:$0xff] }
  0x68   : > { %v323_v33 = vand.u32 2147483647, %v291_v24  ;;  %v262_v35 = vld [vmem:[%s879_s29 + $0xc8] sm:$0xff]  ;;  %v263_v37 = vld [vmem:[%s879_s29 + $0xd0] sm:$0xff]  ;;  %353 = vst [vmem:[%s900_s20 + $0xa0] sm:$0xff] %v321_v28  ;;  %v264_v42 = vld [vmem:[%s879_s29 + $0xd8] sm:$0xff] }
  0x69   : > { %354 = vst [vmem:[%s900_s20 + $0xa8] sm:$0xff] %v322_v29  ;;  %v324_v38 = vand.u32 2147483647, %v292_v30  ;;  %v294_v39 = vsub.f32 %v230_v32, %v262_v35  ;;  %v295_v40 = vsub.f32 %v231_v36, %v263_v37  ;;  %v233_v43 = vld [vmem:[%s871_s19 + $0xe0] sm:$0xff]  ;;  %v325_v44 = vand.u32 2147483647, %v293_v34 }
  0x6a   : > { %355 = vst [vmem:[%s900_s20 + $0xb0] sm:$0xff] %v323_v33  ;;  %v296_v45 = vsub.f32 %v232_v41, %v264_v42  ;;  %v265_v46 = vld [vmem:[%s879_s29 + $0xe0] sm:$0xff]  ;;  %v234_v47 = vld [vmem:[%s871_s19 + $0xe8] sm:$0xff]  ;;  %v235_v53 = vld [vmem:[%s871_s19 + $0xf0] sm:$0xff]  ;;  %s617_s25 = scalar_lea.vmem %s616_s27, 8192 }
  0x6b   : > { %v266_v48 = vld [vmem:[%s879_s29 + $0xe8] sm:$0xff]  ;;  %356 = vst [vmem:[%s900_s20 + $0xb8] sm:$0xff] %v324_v38  ;;  %v326_v49 = vand.u32 2147483647, %v294_v39  ;;  %v327_v50 = vand.u32 2147483647, %v295_v40  ;;  %v297_v51 = vsub.f32 %v233_v43, %v265_v46  ;;  %p619_p5 = scmp.lt.s32.totalorder %s617_s25, %s611_s24 }
  0x6c   : > { %v298_v52 = vsub.f32 %v234_v47, %v266_v48  ;;  %v267_v54 = vld [vmem:[%s879_s29 + $0xf0] sm:$0xff]  ;;  %357 = vst [vmem:[%s900_s20 + $0xc0] sm:$0xff] %v325_v44  ;;  %v328_v55 = vand.u32 2147483647, %v296_v45  ;;  %v236_v57 = vld [vmem:[%s871_s19 + $0xf8] sm:$0xff] }
  0x6d   : > { %v299_v56 = vsub.f32 %v235_v53, %v267_v54  ;;  %v268_v58 = vld [vmem:[%s879_s29 + $0xf8] sm:$0xff]  ;;  %358 = vst [vmem:[%s900_s20 + $0xc8] sm:$0xff] %v326_v49  ;;  %359 = vst [vmem:[%s900_s20 + $0xd0] sm:$0xff] %v327_v50  ;;  %v329_v59 = vand.u32 2147483647, %v297_v51  ;;  %p620_p10 = por %p619_p5, %p618_p4 }
  0x6e   : > { %v330_v60 = vand.u32 2147483647, %v298_v52  ;;  %v300_v61 = vsub.f32 %v236_v57, %v268_v58  ;;  %360 = vst [vmem:[%s900_s20 + $0xd8] sm:$0xff] %v328_v55 }
  0x6f   : > { %v331_v62 = vand.u32 2147483647, %v299_v56  ;;  %361 = vst [vmem:[%s900_s20 + $0xe0] sm:$0xff] %v329_v59  ;;  %p621_p11 = pnand %p620_p10, %p614_p9 }
  0x70   : > { %362 = vst [vmem:[%s900_s20 + $0xe8] sm:$0xff] %v330_v60  ;;  %v332_v63 = vand.u32 2147483647, %v300_v61 }
  0x71   : > { %363 = vst [vmem:[%s900_s20 + $0xf0] sm:$0xff] %v331_v62 }
  0x72   : > { %364 = vst [vmem:[%s900_s20 + $0xf8] sm:$0xff] %v332_v63 }
  0x73   : > { %624 = shalt.err (!%p621_p11)
}
  0x74   : > { %s625_s7 = scalar_lea.hbm %s985_s17, 4096  ;;  %s629_s4 = scalar_lea.hbm %s1036_s2, 16384 }
  0x75   : > { %p626_p7 = scmp.ne.s32.totalorder %s985_s17, %s625_s7  ;;  %p630_p1 = scmp.lt.u32.totalorder %s985_s17, %s1036_s2 }
  0x76   : > { %p631_p3 = scmp.lt.u32.totalorder %s629_s4, %s625_s7  ;;  %p633_p12 = scmp.lt.u32.totalorder %s625_s7, %s985_s17 }
  0x77   : > { %p627_p8 = pnand %p626_p7, %p1046_p0 }
  0x78   : > { %p632_p6 = por %p631_p3, %p630_p1 }
  0x79   : > { %p628_p13 = pneg %p627_p8 }
  0x7a   : > { %p634_p2 = por %p633_p12, %p632_p6 }
  0x7c   : > { %p635_p9 = pnand %p634_p2, %p628_p13 }
  0x7e   : > { %638 = shalt.err (!%p635_p9)
}
  0x7f   : > { %s688_s23 = smov 128   ;;  %s689_s29 = smov 8  }
  0x80   : > { %500 = dma.vmem_to_hbm [thread:$0]  (%p1046_p0), %s987_s6, 4096, %s985_s17, %s366_s28, %s688_s23, %s688_s23, %s689_s29  }
  0x81 PF: > { %p514_p4 = scmp.ge.s32.totalorder %s681_s12, 2  ;;  %s394_s20 = sand.u32 1, %s669_s9  }
  0x82   : > { %p1047_p5 = scmp.ne.s32.totalorder %s1042_s22, 0  ;;  %s395_s5 = scalar_lea.sflag [#allocation4], %s394_s20 }
  0x84   : > { %p510_p10 = pnand %p514_p4, %p1047_p5 }
  0x86   : > { %664 = dma.done.wait (!%p510_p10), %s395_s5, 4096  }
  0x87   : > { %666 = vsyncadd (!%p510_p10), %s395_s5, 4294963200  ;;  %p18_p11 = scmp.ge.s32.totalorder %s730_s15, 6   ;;  %s1048_s9 = smov %s673_s10 }
  0x88   : > { %s1049_s10 = smov %s677_s11  ;;  %s1050_s11 = smov %s742_s18 }
  0x89   : > { %s1051_s12 = smov %s730_s15  ;;  %20 = sbr.rel (!%p18_p11) target bundleno = 7 (0x7), region = 86 }
  0x90   :  { %400 = vsyncpa [#allocation3], 1 }
  0x91   :  { %402 = vsyncpa [#allocation3 + $0x1], 1 }
  0x92   :  { %403 = vsyncpa [#allocation6], 1 }
  0x93   :  { %405 = vsyncpa [#allocation6 + $0x1], 1 }
  0x94   :  { %406 = vsyncpa [#allocation4], 1 }
  0x95   :  { %408 = vsyncpa [#allocation4 + $0x1], 1 }

</bundles_post_ra>
